<compile_context>
chip_gen: v5e
topology: v5e:2x2
jax: 0.10.0
libtpu: 0.0.40
codegen_flags: <defaults>
</compile_context>

<pallas_src>
import functools

import jax
import jax.numpy as jnp
from jax.experimental import pallas as pl
from jax.experimental.pallas import tpu as pltpu


def _round_up(v, m):
    return ((v + m - 1) // m) * m


def _graph_conv_kernel(*refs, add_self, att, bias, normalize, reassoc, tm):
    # ---- unpack refs (inputs then outputs) according to static config ----
    idx = 0
    adj_ref = refs[idx]; idx += 1                    # (1, TM, Np)
    xw_ref = x_ref = w_ref = None
    if reassoc:
        xw_ref = refs[idx]; idx += 1                 # (1, Np, Dp)  f32
    else:
        x_ref = refs[idx]; idx += 1                  # (1, Np, Din_p)
        w_ref = refs[idx]; idx += 1                  # (Din_p, Dp)  f32
    xrow_ref = sw_ref = None
    if add_self:
        if reassoc:
            xrow_ref = refs[idx]; idx += 1           # (1, TM, Din_p)
        sw_ref = refs[idx]; idx += 1                 # (Din_p, Dp)  f32
    xatt_row_ref = xatt_t_ref = None
    if att:
        xatt_row_ref = refs[idx]; idx += 1           # (1, TM, Din_p) f32
        xatt_t_ref = refs[idx]; idx += 1             # (1, Din_p, Np) f32
    b_ref = None
    if bias:
        b_ref = refs[idx]; idx += 1                  # (1, Dp)
    y_ref = refs[idx]; idx += 1                      # (1, TM, Dp)
    adj_out_ref = None
    if att:
        adj_out_ref = refs[idx]; idx += 1            # (1, TM, Np)

    adj_t = adj_ref[0]                               # (TM, Np)

    if att:
        # att_m = x_att_rows @ x_att^T, RHS already transposed in the wrapper
        # -> a plain MXU matmul, no per-tile relayout.
        att_m = jnp.dot(xatt_row_ref[0], xatt_t_ref[0],
                        preferred_element_type=jnp.float32)      # (TM, Np)
        adj_t = adj_t.astype(jnp.float32) * att_m
        adj_out_ref[0] = adj_t.astype(adj_out_ref.dtype)

    # ---- aggregation + projection ----
    if reassoc:
        # adj @ (x @ W): xw precomputed per batch in the wrapper.
        y = jnp.dot(adj_t, xw_ref[0], preferred_element_type=jnp.float32)
    else:
        agg = jnp.dot(adj_t, x_ref[0], preferred_element_type=jnp.float32)
        y = jnp.dot(agg, w_ref[...], preferred_element_type=jnp.float32)

    if add_self:
        if reassoc:
            x_rows = xrow_ref[0]                                 # (TM, Din_p)
        else:
            row0 = pl.multiple_of(pl.program_id(1) * tm, tm)
            x_rows = x_ref[0, pl.ds(row0, tm), :]
        y = y + jnp.dot(x_rows, sw_ref[...], preferred_element_type=jnp.float32)

    if bias:
        y = y + b_ref[...]                                       # (1, Dp) bcast

    if normalize:
        # F.normalize(y, p=2, dim=2): y / max(||y||, 1e-12). Padded cols are 0,
        # so the padded sum-of-squares equals the unpadded one.
        ssq = jnp.sum(y * y, axis=-1, keepdims=True)
        y = y * jax.lax.rsqrt(jnp.maximum(ssq, 1e-24))

    y_ref[0] = y.astype(y_ref.dtype)


def _choose_tm(np_, dp, din_p, adj_isz, x_isz, att, reassoc, add_self,
               tiled_budget):
    """Largest row tile (preferring multiples of 256 for the 256x256 MXU) whose
    double-buffered blocks + f32 temporaries fit the tiled VMEM budget."""
    per_row = 2 * np_ * adj_isz           # adj in (double-buffered)
    per_row += 2 * dp * x_isz             # y out (double-buffered)
    per_row += dp * 4                     # f32 y accumulator temporary
    if att:
        per_row += 2 * np_ * adj_isz      # adj_out (double-buffered)
        per_row += 2 * np_ * 4            # att_m + f32 adj product temporaries
        per_row += 2 * din_p * 4          # x_att row tile (double-buffered)
    if add_self and reassoc:
        per_row += 2 * din_p * x_isz      # x row tile (double-buffered)
    if not reassoc:
        per_row += din_p * 4              # (TM, Din_p) f32 aggregation temp
    cap = max(8, tiled_budget // max(per_row, 1))
    for t in (1024, 512, 256, 128, 64, 32, 16, 8):
        if t <= cap and np_ % t == 0:
            return t, per_row
    return 8, per_row                     # Np is a multiple of 128 -> 8 divides


def graph_conv(x, adj, weight, self_weight=None, att_weight=None, bias_vec=None,
               *, add_self=False, att=False, normalize_embedding=False):
    """Pallas TPU implementation of GraphConv.forward (eval mode / dropout=0)."""
    # TODO(synk): dropout (nn.Dropout) omitted — eval-mode / dropout=0.0 semantics.
    B, N, Din = x.shape
    Dout = weight.shape[1]
    has_bias = bias_vec is not None
    f32 = jnp.float32

    Dp = _round_up(Dout, 128)             # lane-dense output feature dim
    Din_p = _round_up(Din, 128)           # lane-dense input feature dim
    Np = _round_up(N, 128)                # node dim (zero rows/cols are inert)
    reassoc = Dp <= Din_p                 # adj contracts vs (Np, Dp) if not wider

    adj_isz = adj.dtype.itemsize
    x_isz = x.dtype.itemsize
    xf = x.astype(f32)

    # ---- VMEM budget (v7x-aware: 64 MiB/TC -> target 48 MiB, cap 56 MiB) ----
    resident = 0
    if reassoc:
        resident += 2 * Np * Dp * 4                    # xw per-batch block
    else:
        resident += 2 * Np * Din_p * x_isz             # full x per-batch block
        resident += 2 * Din_p * Dp * 4                 # weight
    if add_self:
        resident += 2 * Din_p * Dp * 4                 # self_weight
    if att:
        resident += 2 * Din_p * Np * 4                 # x_att^T per-batch block
    if has_bias:
        resident += 2 * 8 * Dp * 4                     # bias (sublane-padded)

    target_vmem = 48 * 2**20
    tiled_budget = max(2 * 2**20, target_vmem - resident - 2 * 2**20)
    TM, per_row = _choose_tm(Np, Dp, Din_p, adj_isz, x_isz, att, reassoc,
                             add_self, tiled_budget)
    grid = (B, Np // TM)

    # ---- host-side (XLA) per-batch precompute + zero padding, build inputs ----
    inputs, specs = [], []    # specs: (block_shape, index_map, invariant)

    def add_input(arr, block_shape, index_map, invariant=False):
        inputs.append(arr)
        specs.append((block_shape, index_map, invariant))

    adj_p = jnp.pad(adj, ((0, 0), (0, Np - N), (0, Np - N))) if Np != N else adj
    add_input(adj_p, (1, TM, Np), lambda b, j: (b, j, 0))

    if reassoc:
        xw = jnp.matmul(xf, weight.astype(f32))                   # (B, N, Dout)
        xw_p = jnp.pad(xw, ((0, 0), (0, Np - N), (0, Dp - Dout)))
        add_input(xw_p, (1, Np, Dp), lambda b, j: (b, 0, 0))
    else:
        x_p = jnp.pad(x, ((0, 0), (0, Np - N), (0, Din_p - Din)))
        w_p = jnp.pad(weight.astype(f32), ((0, Din_p - Din), (0, Dp - Dout)))
        add_input(x_p, (1, Np, Din_p), lambda b, j: (b, 0, 0))
        add_input(w_p, (Din_p, Dp), lambda b, j: (0, 0), invariant=True)

    if add_self:
        if reassoc:
            x_p = jnp.pad(x, ((0, 0), (0, Np - N), (0, Din_p - Din)))
            add_input(x_p, (1, TM, Din_p), lambda b, j: (b, j, 0))
        sw_p = jnp.pad(self_weight.astype(f32),
                       ((0, Din_p - Din), (0, Dp - Dout)))
        add_input(sw_p, (Din_p, Dp), lambda b, j: (0, 0), invariant=True)

    if att:
        x_att = jnp.matmul(xf, att_weight.astype(f32))            # (B, N, Din)
        x_att_p = jnp.pad(x_att, ((0, 0), (0, Np - N), (0, Din_p - Din)))
        x_att_t = jnp.swapaxes(x_att_p, 1, 2)                     # (B, Din_p, Np)
        add_input(x_att_p, (1, TM, Din_p), lambda b, j: (b, j, 0))
        add_input(x_att_t, (1, Din_p, Np), lambda b, j: (b, 0, 0))

    if has_bias:
        b_p = jnp.pad(bias_vec.astype(f32), (0, Dp - Dout)).reshape(1, Dp)
        add_input(b_p, (1, Dp), lambda b, j: (0, 0), invariant=True)

    # ---- outputs: y always; adj_out only when attention modifies adj ----
    if att:
        out_shape = (jax.ShapeDtypeStruct((B, Np, Dp), x.dtype),
                     jax.ShapeDtypeStruct((B, Np, Np), adj.dtype))
        out_specs = (pl.BlockSpec((1, TM, Dp), lambda b, j: (b, j, 0)),
                     pl.BlockSpec((1, TM, Np), lambda b, j: (b, j, 0)))
    else:
        out_shape = jax.ShapeDtypeStruct((B, Np, Dp), x.dtype)
        out_specs = pl.BlockSpec((1, TM, Dp), lambda b, j: (b, j, 0))

    vmem_est = resident + TM * per_row
    vmem_limit = int(min(56 * 2**20, max(32 * 2**20, int(1.3 * vmem_est))))

    # Advisory cost estimate for the XLA scheduler (kernel-side work only).
    flops = 0
    if att:
        flops += 2 * B * Np * Np * Din_p + B * Np * Np
    if reassoc:
        flops += 2 * B * Np * Np * Dp
    else:
        flops += 2 * B * Np * Np * Din_p + 2 * B * Np * Din_p * Dp
    if add_self:
        flops += 2 * B * Np * Din_p * Dp
    bytes_accessed = sum(int(a.size) * a.dtype.itemsize for a in inputs)
    bytes_accessed += B * Np * Dp * x_isz
    if att:
        bytes_accessed += B * Np * Np * adj_isz
    cost = pl.CostEstimate(flops=int(flops),
                           transcendentals=B * Np if normalize_embedding else 0,
                           bytes_accessed=int(bytes_accessed))

    kernel = functools.partial(
        _graph_conv_kernel, add_self=add_self, att=att, bias=has_bias,
        normalize=normalize_embedding, reassoc=reassoc, tm=TM)

    def run(single_buffer_invariants):
        in_specs = []
        for block_shape, index_map, invariant in specs:
            if invariant and single_buffer_invariants:
                # Grid-invariant block: one buffer, no wasted double-buffering.
                in_specs.append(pl.BlockSpec(block_shape, index_map,
                                             pipeline_mode=pl.Buffered(1)))
            else:
                in_specs.append(pl.BlockSpec(block_shape, index_map))
        return pl.pallas_call(
            kernel,
            out_shape=out_shape,
            grid_spec=pltpu.PrefetchScalarGridSpec(
                num_scalar_prefetch=0,
                grid=grid,
                in_specs=in_specs,
                out_specs=out_specs,
            ),
            compiler_params=pltpu.CompilerParams(
                dimension_semantics=("parallel", "parallel"),
                vmem_limit_bytes=vmem_limit,
            ),
            cost_estimate=cost,
        )(*inputs)

    try:
        result = run(True)
    except Exception:
        # Fallback for jax versions without single-buffer pipeline_mode support.
        result = run(False)

    if att:
        y_pad, adj_out_pad = result
        adj_out = adj_out_pad[:, :N, :N] if Np != N else adj_out_pad
    else:
        y_pad = result
        adj_out = adj                       # unchanged: skip redundant N^2 write

    y = y_pad[:, :N, :Dout] if (Np != N or Dp != Dout) else y_pad
    return y, adj_out


def graph_conv_ref(x, adj, weight, self_weight=None, att_weight=None,
                   bias_vec=None, *, add_self=False, att=False,
                   normalize_embedding=False):
    """Pure-JAX reference mirroring the PyTorch forward."""
    adj = adj.astype(jnp.float32)
    xf = x.astype(jnp.float32)
    if att:
        x_att = jnp.matmul(xf, att_weight)
        att_m = jnp.matmul(x_att, jnp.swapaxes(x_att, 1, 2))
        adj = adj * att_m
    y = jnp.matmul(adj, xf)
    y = jnp.matmul(y, weight)
    if add_self:
        y = y + jnp.matmul(xf, self_weight)
    if bias_vec is not None:
        y = y + bias_vec
    if normalize_embedding:
        nrm = jnp.sqrt(jnp.sum(y * y, axis=-1, keepdims=True))
        y = y / jnp.maximum(nrm, 1e-12)
    return y, adj


if __name__ == "__main__":
    B, N, Din, Dout = 2, 16, 32, 8

    key = jax.random.PRNGKey(0)
    kx, kadj, kw, ksw, kaw, kb = jax.random.split(key, 6)

    x = jax.random.normal(kx, (B, N, Din), dtype=jnp.float32)
    adj = (jax.random.uniform(kadj, (B, N, N), dtype=jnp.float32) > 0.5).astype(jnp.float32)
    weight = jax.random.normal(kw, (Din, Dout), dtype=jnp.float32) * 0.1
    self_weight = jax.random.normal(ksw, (Din, Dout), dtype=jnp.float32) * 0.1
    att_weight = jax.random.normal(kaw, (Din, Din), dtype=jnp.float32) * 0.1
    bias_vec = jax.random.normal(kb, (Dout,), dtype=jnp.float32) * 0.1

    # Default configuration: bias=True, add_self=False, att=False, normalize=False
    y, adj_out = graph_conv(x, adj, weight, bias_vec=bias_vec)
    jax.block_until_ready((y, adj_out))
    y_ref, adj_ref = graph_conv_ref(x, adj, weight, bias_vec=bias_vec)
    assert jnp.allclose(y, y_ref, atol=1e-4, rtol=1e-4)
    assert jnp.allclose(adj_out, adj_ref, atol=1e-4, rtol=1e-4)

    # Full-featured configuration: att + add_self + bias + normalize_embedding
    y2, adj_out2 = graph_conv(
        x, adj, weight, self_weight=self_weight, att_weight=att_weight,
        bias_vec=bias_vec, add_self=True, att=True, normalize_embedding=True)
    jax.block_until_ready((y2, adj_out2))
    y2_ref, adj2_ref = graph_conv_ref(
        x, adj, weight, self_weight=self_weight, att_weight=att_weight,
        bias_vec=bias_vec, add_self=True, att=True, normalize_embedding=True)
    assert jnp.allclose(y2, y2_ref, atol=1e-4, rtol=1e-4)
    assert jnp.allclose(adj_out2, adj2_ref, atol=1e-4, rtol=1e-4)

    print("KERNEL_OK")
</pallas_src>

<mosaic_0001>
module attributes {stable_mosaic.version = 11 : i64} {
  func.func @_graph_conv_kernel(%arg0: i32, %arg1: i32, %arg2: memref<1x128x128xf32, #tpu.memory_space<vmem>>, %arg3: memref<1x128x128xf32, #tpu.memory_space<vmem>>, %arg4: memref<1x128xf32, #tpu.memory_space<vmem>>, %arg5: memref<1x128x128xf32, #tpu.memory_space<vmem>>) attributes {dimension_semantics = [#tpu.dimension_semantics<parallel>, #tpu.dimension_semantics<parallel>], iteration_bounds = array<i64: 2, 1>, scalar_prefetch = 0 : i64, scratch_operands = 0 : i64, tpu.core_type = #tpu.core_type<tc>, window_params = [{transform_indices = @transform_0, window_bounds = array<i64: 1, 128, 128>}, {transform_indices = @transform_1, window_bounds = array<i64: 1, 128, 128>}, {pipeline_mode = #tpu.pipeline_mode<synchronous>, transform_indices = @transform_2, window_bounds = array<i64: 1, 128>}, {transform_indices = @transform_3, window_bounds = array<i64: 1, 128, 128>}]} {
    %c0 = arith.constant 0 : index
    %c0_0 = arith.constant 0 : index
    %c0_1 = arith.constant 0 : index
    %0 = vector.load %arg2[%c0, %c0_0, %c0_1] : memref<1x128x128xf32, #tpu.memory_space<vmem>>, vector<1x128x128xf32>
    %1 = vector.shape_cast %0 : vector<1x128x128xf32> to vector<128x128xf32>
    %c0_2 = arith.constant 0 : index
    %c0_3 = arith.constant 0 : index
    %c0_4 = arith.constant 0 : index
    %2 = vector.load %arg3[%c0_2, %c0_3, %c0_4] : memref<1x128x128xf32, #tpu.memory_space<vmem>>, vector<1x128x128xf32>
    %3 = vector.shape_cast %2 : vector<1x128x128xf32> to vector<128x128xf32>
    %cst = arith.constant dense<0.000000e+00> : vector<128x128xf32>
    %4 = tpu.matmul %1, %3, %cst {dimension_numbers = #tpu.dot_dimension_numbers<[1], [0], [0], [1], [0, 0, 1, 1], [], []>} : vector<128x128xf32>, vector<128x128xf32>, vector<128x128xf32> -> vector<128x128xf32>
    %c0_5 = arith.constant 0 : index
    %c0_6 = arith.constant 0 : index
    %5 = vector.load %arg4[%c0_5, %c0_6] : memref<1x128xf32, #tpu.memory_space<vmem>>, vector<1x128xf32>
    %6 = vector.broadcast %5 : vector<1x128xf32> to vector<128x128xf32>
    %7 = arith.addf %4, %6 : vector<128x128xf32>
    %c0_7 = arith.constant 0 : index
    %c0_8 = arith.constant 0 : index
    %c0_9 = arith.constant 0 : index
    %8 = vector.load %arg5[%c0_7, %c0_8, %c0_9] : memref<1x128x128xf32, #tpu.memory_space<vmem>>, vector<1x128x128xf32>
    %9 = vector.shape_cast %8 : vector<1x128x128xf32> to vector<128x128xf32>
    %10 = vector.shape_cast %7 : vector<128x128xf32> to vector<1x128x128xf32>
    tpu.vector_store %arg5[%c0_7, %c0_8, %c0_9], %10 {strides = array<i32>} : memref<1x128x128xf32, #tpu.memory_space<vmem>>, vector<1x128x128xf32>,
    return
  }
  func.func @transform_0(%arg0: i32, %arg1: i32) -> (i32, i32, i32) {
    %c0_i32 = arith.constant 0 : i32
    %c0_i32_0 = arith.constant 0 : i32
    return %arg0, %arg1, %c0_i32 : i32, i32, i32
  }
  func.func @transform_1(%arg0: i32, %arg1: i32) -> (i32, i32, i32) {
    %c0_i32 = arith.constant 0 : i32
    %c0_i32_0 = arith.constant 0 : i32
    %c0_i32_1 = arith.constant 0 : i32
    return %arg0, %c0_i32, %c0_i32_0 : i32, i32, i32
  }
  func.func @transform_2(%arg0: i32, %arg1: i32) -> (i32, i32) {
    %c0_i32 = arith.constant 0 : i32
    %c0_i32_0 = arith.constant 0 : i32
    %c0_i32_1 = arith.constant 0 : i32
    return %c0_i32, %c0_i32_0 : i32, i32
  }
  func.func @transform_3(%arg0: i32, %arg1: i32) -> (i32, i32, i32) {
    %c0_i32 = arith.constant 0 : i32
    %c0_i32_0 = arith.constant 0 : i32
    return %arg0, %arg1, %c0_i32 : i32, i32, i32
  }
}

module attributes {stable_mosaic.version = 11 : i64} {
  func.func @_graph_conv_kernel(%arg0: i32, %arg1: i32, %arg2: memref<1x128x128xf32, #tpu.memory_space<vmem>>, %arg3: memref<1x128x128xf32, #tpu.memory_space<vmem>>, %arg4: memref<1x128xf32, #tpu.memory_space<vmem>>, %arg5: memref<1x128x128xf32, #tpu.memory_space<vmem>>) attributes {dimension_semantics = [#tpu.dimension_semantics<parallel>, #tpu.dimension_semantics<parallel>], iteration_bounds = array<i64: 2, 1>, scalar_prefetch = 0 : i64, scratch_operands = 0 : i64, tpu.core_type = #tpu.core_type<tc>, window_params = [{transform_indices = @transform_0, window_bounds = array<i64: 1, 128, 128>}, {transform_indices = @transform_1, window_bounds = array<i64: 1, 128, 128>}, {pipeline_mode = #tpu.pipeline_mode<synchronous>, transform_indices = @transform_2, window_bounds = array<i64: 1, 128>}, {transform_indices = @transform_3, window_bounds = array<i64: 1, 128, 128>}]} {
    %c0 = arith.constant 0 : index
    %c0_0 = arith.constant 0 : index
    %c0_1 = arith.constant 0 : index
    %0 = vector.load %arg2[%c0, %c0_0, %c0_1] : memref<1x128x128xf32, #tpu.memory_space<vmem>>, vector<1x128x128xf32>
    %1 = vector.shape_cast %0 : vector<1x128x128xf32> to vector<128x128xf32>
    %c0_2 = arith.constant 0 : index
    %c0_3 = arith.constant 0 : index
    %c0_4 = arith.constant 0 : index
    %2 = vector.load %arg3[%c0_2, %c0_3, %c0_4] : memref<1x128x128xf32, #tpu.memory_space<vmem>>, vector<1x128x128xf32>
    %3 = vector.shape_cast %2 : vector<1x128x128xf32> to vector<128x128xf32>
    %cst = arith.constant dense<0.000000e+00> : vector<128x128xf32>
    %4 = tpu.matmul %1, %3, %cst {dimension_numbers = #tpu.dot_dimension_numbers<[1], [0], [0], [1], [0, 0, 1, 1], [], []>} : vector<128x128xf32>, vector<128x128xf32>, vector<128x128xf32> -> vector<128x128xf32>
    %c0_5 = arith.constant 0 : index
    %c0_6 = arith.constant 0 : index
    %5 = vector.load %arg4[%c0_5, %c0_6] : memref<1x128xf32, #tpu.memory_space<vmem>>, vector<1x128xf32>
    %6 = vector.broadcast %5 : vector<1x128xf32> to vector<128x128xf32>
    %7 = arith.addf %4, %6 : vector<128x128xf32>
    %c0_7 = arith.constant 0 : index
    %c0_8 = arith.constant 0 : index
    %c0_9 = arith.constant 0 : index
    %8 = vector.load %arg5[%c0_7, %c0_8, %c0_9] : memref<1x128x128xf32, #tpu.memory_space<vmem>>, vector<1x128x128xf32>
    %9 = vector.shape_cast %8 : vector<1x128x128xf32> to vector<128x128xf32>
    %10 = vector.shape_cast %7 : vector<128x128xf32> to vector<1x128x128xf32>
    tpu.vector_store %arg5[%c0_7, %c0_8, %c0_9], %10 {strides = array<i32>} : memref<1x128x128xf32, #tpu.memory_space<vmem>>, vector<1x128x128xf32>,
    return
  }
  func.func @transform_0(%arg0: i32, %arg1: i32) -> (i32, i32, i32) {
    %c0_i32 = arith.constant 0 : i32
    %c0_i32_0 = arith.constant 0 : i32
    return %arg0, %arg1, %c0_i32 : i32, i32, i32
  }
  func.func @transform_1(%arg0: i32, %arg1: i32) -> (i32, i32, i32) {
    %c0_i32 = arith.constant 0 : i32
    %c0_i32_0 = arith.constant 0 : i32
    %c0_i32_1 = arith.constant 0 : i32
    return %arg0, %c0_i32, %c0_i32_0 : i32, i32, i32
  }
  func.func @transform_2(%arg0: i32, %arg1: i32) -> (i32, i32) {
    %c0_i32 = arith.constant 0 : i32
    %c0_i32_0 = arith.constant 0 : i32
    %c0_i32_1 = arith.constant 0 : i32
    return %c0_i32, %c0_i32_0 : i32, i32
  }
  func.func @transform_3(%arg0: i32, %arg1: i32) -> (i32, i32, i32) {
    %c0_i32 = arith.constant 0 : i32
    %c0_i32_0 = arith.constant 0 : i32
    return %arg0, %arg1, %c0_i32 : i32, i32, i32
  }
}

</mosaic_0001>

<bundles_post_ra>
// kernel: tpu_custom_call.1
= control target key start
LH: loop header
LB: loop body
LE: loop exit
PB: predicated region body
PF: predicated region fallthrough
CT: control target
= control target key end

     0   :  { %s1016_s0 = inlined_call_operand.hbm [shape: f32[2,128,128], index: 0, kind: input, shape index: {}]   ;;  %s1017_s1 = inlined_call_operand.hbm [shape: f32[2,128,128], index: 1, kind: input, shape index: {}]   ;;  %s1018_s2 = inlined_call_operand.vmem [shape: f32[1,128], index: 2, kind: input, shape index: {}]   ;;  %s1019_s3 = inlined_call_operand.hbm [shape: f32[2,128,128], index: 3, kind: output, shape index: {}]  }
   0x1   :  { %1020 = sst [smem:[#allocation11_spill]] %s1016_s0 }
   0x2   :  { %8 = vsyncpa [#allocation3], 0 }
   0x3   :  { %10 = vsyncpa [#allocation3 + $0x1], 0 }
   0x4   :  { %11 = vsyncpa [#allocation6], 0 }
   0x5   :  { %13 = vsyncpa [#allocation6 + $0x1], 0 }
   0x6   :  { %14 = vsyncpa [#allocation4], 0 }
   0x7   :  { %16 = vsyncpa [#allocation4 + $0x1], 0  ;;  %s812_s12 = smov 0   ;;  %s814_s13 = smov 0  }
   0x8   :  { %s816_s14 = smov 0   ;;  %s818_s15 = smov 0  }
   0x9   :  { %s820_s16 = smov 0   ;;  %s822_s17 = smov 0  }
   0xa LB: > { %s498_s18 = sadd.s32 4294967295, %s786_s17   ;;  %s499_s19 = sadd.s32 4294967294, %s786_s17   ;;  %s786_s17 = sphi %s822_s17, %s22_s17   ;;  %s782_s16 = sphi %s820_s16, %s1031_s16   ;;  %s778_s15 = sphi %s818_s15, %s1030_s15   ;;  %s774_s14 = sphi %s816_s14, %s1029_s14   ;;  %s770_s13 = sphi %s814_s13, %s1028_s13   ;;  %s766_s12 = sphi %s812_s12, %s1027_s12  }
   0xb   : > { %s34_s20 = sadd.s32 1, %s782_s16  ;;  %s43_s21 = sadd.s32 1, %s774_s14 }
   0xc   : > { %p36_p0 = scmp.ge.s32.totalorder %s34_s20, 2  ;;  %p50_p1 = scmp.ne.s32.totalorder %s774_s14, %s770_s13 }
   0xd   : > { %p51_p2 = scmp.eq.s32.totalorder %s786_s17, 0  ;;  %p56_p3 = scmp.ne.s32.totalorder %s770_s13, %s766_s12 }
   0xe   : > { %s1033_s20 = smov (%p36_p0, %s34_s20), 0  ;;  %p57_p5 = scmp.eq.s32.totalorder %s498_s18, 0 }
   0xf   : > { %p853_p4 = por %p51_p2, %p50_p1  ;;  %s38_s23 = ssub.s32 %s782_s16, %s1033_s20 }
  0x10   : > { %p129_p6 = scmp.eq.s32.totalorder %s498_s18, 1  ;;  %p41_p7 = scmp.eq.s32.totalorder %s38_s23, 0 }
  0x11   : > { %p859_p8 = por %p57_p5, %p56_p3  ;;  %p135_p10 = scmp.eq.s32.totalorder %s499_s19, 1 }
  0x12   : > { %p863_p9 = por %p129_p6, %p50_p1  ;;  %p501_p12 = scmp.ge.s32.totalorder %s786_s17, 2 }
  0x13   : > { %s868_s26 = scalar_select %p41_p7, %s774_s14, %s43_s21  }
  0x14   : > { %p870_p11 = por %p135_p10, %p56_p3  ;;  %p585_p13 = scmp.lt.s32.totalorder %s786_s17, 2 }
  0x15   : > { %s877_s28 = sand.u32 1, %s774_s14   ;;  %s517_s30 = sshll.u32 %s782_s16, 7 }
  0x16   : > { %s502_s29 = sshll.u32 %s877_s28, 7  ;;  %s1025_s0 = sld [smem:[#allocation11_spill]] }
  0x17   : > { %s162_s7 = scalar_lea.vmem [#allocation2], %s502_s29  ;;  %p886_p0 = pnand %p585_p13, %p853_p4 }
  0x18   : > { %s172_s8 = sshll.u32 %s162_s7, 4  ;;  %p508_p1 = scmp.ge.s32.totalorder %s786_s17, 1  ;;  %s173_s8 = int_to_ptr.vmem [resolvable:$true] %s172_s8 }
  0x19   : > { %s159_s11 = scalar_lea.sflag [#allocation3], %s877_s28  ;;  %s788_s18 = smov 128  }
  0x1a   : > { %s789_s19 = smov 8   ;;  %p202_p2 = scmp.lt.s32.totalorder %s786_s17, 3 }
  0x1b   : > { %s191_s4 = scalar_lea.hbm %s1017_s1, %s517_s30  ;;  %s186_s22 = scalar_lea.vmem [#allocation5], %s502_s29 }
  0x1c   : > { %s169_s6 = scalar_lea.hbm %s1025_s0, %s517_s30  ;;  %p203_p3 = pnand %p508_p1, %p202_p2 }
  0x1d   : > { %s170_s9 = sshll.u32 %s169_s6, 4  ;;  %s192_s5 = sshll.u32 %s191_s4, 4  ;;  %s171_s9 = int_to_ptr.hbm [resolvable:$true] %s170_s9  ;;  %s193_s5 = int_to_ptr.hbm [resolvable:$true] %s192_s5 }
  0x1e   : > { %577 = dma.hbm_to_vmem [thread:$0]  (!%p886_p0), %s171_s9, 2048, %s173_s8, %s159_s11, %s788_s18, %s788_s18, %s789_s19  }
  0x1f   : > { %s194_s6 = sshll.u32 %s186_s22, 4  ;;  %s183_s7 = scalar_lea.sflag [#allocation6], %s877_s28  ;;  %s195_s6 = int_to_ptr.vmem [resolvable:$true] %s194_s6 }
  0x20   : > { %580 = dma.hbm_to_vmem [thread:$0]  (!%p886_p0), %s193_s5, 2048, %s195_s6, %s183_s7, %s788_s18, %s788_s18, %s789_s19  }
  0x21   : > { %206 = sbr.rel (%p203_p3) target bundleno = 236 (0xec), region = 32  ;;  %s902_s0 = sand.u32 (!%p203_p3), 1, %s770_s13  }
  0x22   : > { %s905_s8 = sshll.u32 (!%p203_p3), %s902_s0, 7  ;;  %s209_s30 = scalar_lea.sflag (!%p203_p3), [#allocation3], %s902_s0 }
  0x23   : > { %s909_s9 = scalar_lea.vmem (!%p203_p3), [#allocation2], %s905_s8 }
  0x26   : > { %753 = dma.done.wait (%p859_p8), %s209_s30, 2048  }
  0x27   : > { %755 = vsyncadd (%p859_p8), %s209_s30, 4294965248  ;;  %s219_s28 = scalar_lea.sflag [#allocation6], %s902_s0  ;;  %s917_s29 = scalar_lea.vmem [#allocation5], %s905_s8 }
  0x28   : > { %757 = dma.done.wait (%p859_p8), %s219_s28, 2048  }
  0x29   : > { %759 = vsyncadd (%p859_p8), %s219_s28, 4294965248  ;;  %v284_v0 = vld [vmem:[%s917_s29 + $0x78] sm:$0xff]  ;;  %v283_v1 = vld [vmem:[%s917_s29 + $0x70] sm:$0xff]  ;;  %s959_s11 = scalar_lea.vmem [#allocation7], %s905_s8  ;;  %s519_s18 = sshll.u32 %s778_s15, 7 }
  0x2a   : > { %521 = vmatpush.msra.mxu2 %v284_v0  ;;  %522 = vmatpush.msra.mxu3 %v284_v0  ;;  %v282_v2 = vld [vmem:[%s917_s29 + $0x68] sm:$0xff]  ;;  %v281_v3 = vld [vmem:[%s917_s29 + $0x60] sm:$0xff]  ;;  %v280_v4 = vld [vmem:[%s917_s29 + $0x58] sm:$0xff]  ;;  %s384_s23 = scalar_lea.hbm %s1019_s3, %s519_s18  ;;  %s385_s4 = sshll.u32 %s959_s11, 4  ;;  %s386_s4 = int_to_ptr.vmem [resolvable:$true] %s385_s4 }
  0x2b   : > { %289 = vmatpush.msra.mxu0 %v284_v0  ;;  %520 = vmatpush.msra.mxu1 %v284_v0  ;;  %v279_v5 = vld [vmem:[%s917_s29 + $0x50] sm:$0xff]  ;;  %v278_v6 = vld [vmem:[%s917_s29 + $0x48] sm:$0xff]  ;;  %v277_v7 = vld [vmem:[%s917_s29 + $0x40] sm:$0xff]  ;;  %s387_s5 = sshll.u32 %s384_s23, 4  ;;  %s371_s15 = scalar_lea.sflag [#allocation4], %s902_s0  ;;  %s388_s5 = int_to_ptr.hbm [resolvable:$true] %s387_s5 }
  0x2c   : > { %524 = vmatpush.msra.mxu2 %v283_v1  ;;  %525 = vmatpush.msra.mxu3 %v283_v1  ;;  %v276_v8 = vld [vmem:[%s917_s29 + $0x38] sm:$0xff]  ;;  %v275_v9 = vld [vmem:[%s917_s29 + $0x30] sm:$0xff]  ;;  %v274_v10 = vld [vmem:[%s917_s29 + $0x28] sm:$0xff]  ;;  %s714_s22 = sshra.s32 %s388_s5, 4  ;;  %s720_s30 = scalar_lea.hbm %s1019_s3, 256  ;;  %s715_s22 = int_to_ptr.hbm [resolvable:$true] %s714_s22 }
  0x2d   : > { %290 = vmatpush.msra.mxu0 %v283_v1  ;;  %523 = vmatpush.msra.mxu1 %v283_v1  ;;  %v273_v11 = vld [vmem:[%s917_s29 + $0x20] sm:$0xff]  ;;  %v272_v12 = vld [vmem:[%s917_s29 + $0x18] sm:$0xff]  ;;  %v271_v13 = vld [vmem:[%s917_s29 + $0x10] sm:$0xff]  ;;  %s716_s6 = scalar_lea.hbm %s715_s22, 128  ;;  %p721_p7 = scmp.lt.s32.totalorder %s715_s22, %s1019_s3 }
  0x2e   : > { %527 = vmatpush.msra.mxu2 %v282_v2  ;;  %528 = vmatpush.msra.mxu3 %v282_v2  ;;  %v270_v14 = vld [vmem:[%s917_s29 + $0x8] sm:$0xff]  ;;  %v269_v15 = vld [vmem:[%s917_s29] sm:$0xff]  ;;  %v263_v24 = vld [vmem:[%s909_s9 + $0x50] sm:$0xff]  ;;  %p717_p4 = scmp.ne.s32.totalorder %s715_s22, %s716_s6  ;;  %p722_p8 = scmp.lt.s32.totalorder %s720_s30, %s716_s6 }
  0x2f   : > { %291 = vmatpush.msra.mxu0 %v282_v2  ;;  %526 = vmatpush.msra.mxu1 %v282_v2  ;;  %v261_v16 = vld [vmem:[%s909_s9 + $0x40] sm:$0xff]  ;;  %v262_v20 = vld [vmem:[%s909_s9 + $0x48] sm:$0xff]  ;;  %v267_v25 = vld [vmem:[%s909_s9 + $0x70] sm:$0xff] }
  0x30   : > { %530 = vmatpush.msra.mxu2 %v281_v3  ;;  %531 = vmatpush.msra.mxu3 %v281_v3  ;;  %v265_v17 = vld [vmem:[%s909_s9 + $0x60] sm:$0xff]  ;;  %v266_v21 = vld [vmem:[%s909_s9 + $0x68] sm:$0xff]  ;;  %v255_v26 = vld [vmem:[%s909_s9 + $0x10] sm:$0xff]  ;;  %p718_p5 = pnand %p717_p4, %p863_p9  ;;  %p723_p10 = por %p722_p8, %p721_p7 }
  0x31   : > { %292 = vmatpush.msra.mxu0 %v281_v3  ;;  %529 = vmatpush.msra.mxu1 %v281_v3  ;;  %v253_v18 = vld [vmem:[%s909_s9] sm:$0xff]  ;;  %v254_v22 = vld [vmem:[%s909_s9 + $0x8] sm:$0xff]  ;;  %v259_v27 = vld [vmem:[%s909_s9 + $0x30] sm:$0xff] }
  0x32   : > { %533 = vmatpush.msra.mxu2 %v280_v4  ;;  %534 = vmatpush.msra.mxu3 %v280_v4  ;;  %v257_v19 = vld [vmem:[%s909_s9 + $0x20] sm:$0xff]  ;;  %v258_v23 = vld [vmem:[%s909_s9 + $0x28] sm:$0xff]  ;;  %v264_v28 = vld [vmem:[%s909_s9 + $0x58] sm:$0xff]  ;;  %p719_p6 = pneg %p718_p5 }
  0x33   : > { %293 = vmatpush.msra.mxu0 %v280_v4  ;;  %532 = vmatpush.msra.mxu1 %v280_v4  ;;  %v268_v29 = vld [vmem:[%s909_s9 + $0x78] sm:$0xff]  ;;  %v639_v32 = vld [vmem:[%s1018_s2] ss:$0 sm:$0xff] }
  0x34   : > { %536 = vmatpush.msra.mxu2 %v279_v5  ;;  %537 = vmatpush.msra.mxu3 %v279_v5  ;;  %v256_v30 = vld [vmem:[%s909_s9 + $0x18] sm:$0xff]  ;;  %p724_p13 = pnand %p723_p10, %p719_p6 }
  0x35   : > { %294 = vmatpush.msra.mxu0 %v279_v5  ;;  %535 = vmatpush.msra.mxu1 %v279_v5  ;;  %v260_v31 = vld [vmem:[%s909_s9 + $0x38] sm:$0xff] }
  0x36   : > { %539 = vmatpush.msra.mxu2 %v278_v6  ;;  %540 = vmatpush.msra.mxu3 %v278_v6 }
  0x37   : > { %295 = vmatpush.msra.mxu0 %v278_v6  ;;  %538 = vmatpush.msra.mxu1 %v278_v6 }
  0x38   : > { %542 = vmatpush.msra.mxu2 %v277_v7  ;;  %543 = vmatpush.msra.mxu3 %v277_v7 }
  0x39   : > { %296 = vmatpush.msra.mxu0 %v277_v7  ;;  %541 = vmatpush.msra.mxu1 %v277_v7 }
  0x3a   : > { %545 = vmatpush.msra.mxu2 %v276_v8  ;;  %546 = vmatpush.msra.mxu3 %v276_v8 }
  0x3b   : > { %297 = vmatpush.msra.mxu0 %v276_v8  ;;  %544 = vmatpush.msra.mxu1 %v276_v8 }
  0x3c   : > { %548 = vmatpush.msra.mxu2 %v275_v9  ;;  %549 = vmatpush.msra.mxu3 %v275_v9 }
  0x3d   : > { %298 = vmatpush.msra.mxu0 %v275_v9  ;;  %547 = vmatpush.msra.mxu1 %v275_v9 }
  0x3e   : > { %551 = vmatpush.msra.mxu2 %v274_v10  ;;  %552 = vmatpush.msra.mxu3 %v274_v10 }
  0x3f   : > { %299 = vmatpush.msra.mxu0 %v274_v10  ;;  %550 = vmatpush.msra.mxu1 %v274_v10 }
  0x40   : > { %554 = vmatpush.msra.mxu2 %v273_v11  ;;  %555 = vmatpush.msra.mxu3 %v273_v11 }
  0x41   : > { %300 = vmatpush.msra.mxu0 %v273_v11  ;;  %553 = vmatpush.msra.mxu1 %v273_v11 }
  0x42   : > { %557 = vmatpush.msra.mxu2 %v272_v12  ;;  %558 = vmatpush.msra.mxu3 %v272_v12 }
  0x43   : > { %301 = vmatpush.msra.mxu0 %v272_v12  ;;  %556 = vmatpush.msra.mxu1 %v272_v12 }
  0x44   : > { %560 = vmatpush.msra.mxu2 %v271_v13  ;;  %561 = vmatpush.msra.mxu3 %v271_v13 }
  0x45   : > { %302 = vmatpush.msra.mxu0 %v271_v13  ;;  %559 = vmatpush.msra.mxu1 %v271_v13 }
  0x46   : > { %563 = vmatpush.msra.mxu2 %v270_v14  ;;  %564 = vmatpush.msra.mxu3 %v270_v14 }
  0x47   : > { %303 = vmatpush.msra.mxu0 %v270_v14  ;;  %562 = vmatpush.msra.mxu1 %v270_v14 }
  0x48   : > { %566 = vmatpush.msra.mxu2 %v269_v15  ;;  %567 = vmatpush.msra.mxu3 %v269_v15 }
  0x49   : > { %329 = vmatmul.f32.vlgmr.msra.gmra.mxu2 %v261_v16  ;;  %341 = vmatmul.f32.vlgmr.msra.gmra.mxu3 %v265_v17 }
  0x4a   : > { %304 = vmatpush.msra.mxu0 %v269_v15  ;;  %565 = vmatpush.msra.mxu1 %v269_v15 }
  0x4b   : > { %305 = vmatmul.f32.vlgmr.msra.gmra.mxu0 %v253_v18  ;;  %317 = vmatmul.f32.vlgmr.msra.gmra.mxu1 %v257_v19 }
  0x51   : > { %332 = vmatmul.f32.gmra.mxu2 %v262_v20  ;;  %344 = vmatmul.f32.gmra.mxu3 %v266_v21 }
  0x53   : > { %308 = vmatmul.f32.gmra.mxu0 %v254_v22  ;;  %320 = vmatmul.f32.gmra.mxu1 %v258_v23 }
  0x59   : > { %335 = vmatmul.f32.gmra.mxu2 %v263_v24  ;;  %347 = vmatmul.f32.gmra.mxu3 %v267_v25 }
  0x5b   : > { %311 = vmatmul.f32.gmra.mxu0 %v255_v26  ;;  %323 = vmatmul.f32.gmra.mxu1 %v259_v27 }
  0x61   : > { %338 = vmatmul.f32.gmra.mxu2 %v264_v28  ;;  %350 = vmatmul.f32.gmra.mxu3 %v268_v29 }
  0x63   : > { %314 = vmatmul.f32.gmra.mxu0 %v256_v30  ;;  %326 = vmatmul.f32.gmra.mxu1 %v260_v31 }
  0xc8   : > { %v306_v33 = vpop.f32.mrf.mxu0  ;;  %v318_v34 = vpop.f32.mrf.mxu1 }
  0xc9   : > { %v307_v35 = vadd.f32 %v639_v32, %v306_v33  ;;  %v319_v36 = vadd.f32 %v639_v32, %v318_v34 }
  0xcb   : > { %354 = vst [vmem:[%s959_s11] sm:$0xff] %v307_v35 }
  0xcc   : > { %358 = vst [vmem:[%s959_s11 + $0x20] sm:$0xff] %v319_v36  ;;  %v330_v37 = vpop.f32.mrf.mxu2  ;;  %v342_v38 = vpop.f32.mrf.mxu3 }
  0xcd   : > { %v331_v39 = vadd.f32 %v639_v32, %v330_v37  ;;  %v343_v40 = vadd.f32 %v639_v32, %v342_v38 }
  0xcf   : > { %362 = vst [vmem:[%s959_s11 + $0x40] sm:$0xff] %v331_v39 }
  0xd0   : > { %366 = vst [vmem:[%s959_s11 + $0x60] sm:$0xff] %v343_v40  ;;  %v309_v41 = vpop.f32.mrf.mxu0  ;;  %v321_v42 = vpop.f32.mrf.mxu1 }
  0xd1   : > { %v310_v43 = vadd.f32 %v639_v32, %v309_v41  ;;  %v322_v44 = vadd.f32 %v639_v32, %v321_v42 }
  0xd3   : > { %355 = vst [vmem:[%s959_s11 + $0x8] sm:$0xff] %v310_v43 }
  0xd4   : > { %359 = vst [vmem:[%s959_s11 + $0x28] sm:$0xff] %v322_v44  ;;  %v333_v45 = vpop.f32.mrf.mxu2  ;;  %v345_v46 = vpop.f32.mrf.mxu3 }
  0xd5   : > { %v334_v47 = vadd.f32 %v639_v32, %v333_v45  ;;  %v346_v48 = vadd.f32 %v639_v32, %v345_v46 }
  0xd7   : > { %363 = vst [vmem:[%s959_s11 + $0x48] sm:$0xff] %v334_v47 }
  0xd8   : > { %367 = vst [vmem:[%s959_s11 + $0x68] sm:$0xff] %v346_v48  ;;  %v312_v49 = vpop.f32.mrf.mxu0  ;;  %v324_v50 = vpop.f32.mrf.mxu1 }
  0xd9   : > { %v313_v51 = vadd.f32 %v639_v32, %v312_v49  ;;  %v325_v52 = vadd.f32 %v639_v32, %v324_v50 }
  0xdb   : > { %356 = vst [vmem:[%s959_s11 + $0x10] sm:$0xff] %v313_v51 }
  0xdc   : > { %360 = vst [vmem:[%s959_s11 + $0x30] sm:$0xff] %v325_v52  ;;  %v336_v53 = vpop.f32.mrf.mxu2  ;;  %v348_v54 = vpop.f32.mrf.mxu3 }
  0xdd   : > { %v337_v55 = vadd.f32 %v639_v32, %v336_v53  ;;  %v349_v56 = vadd.f32 %v639_v32, %v348_v54 }
  0xdf   : > { %364 = vst [vmem:[%s959_s11 + $0x50] sm:$0xff] %v337_v55 }
  0xe0   : > { %368 = vst [vmem:[%s959_s11 + $0x70] sm:$0xff] %v349_v56  ;;  %v315_v57 = vpop.f32.mrf.mxu0  ;;  %v327_v58 = vpop.f32.mrf.mxu1 }
  0xe1   : > { %v316_v59 = vadd.f32 %v639_v32, %v315_v57  ;;  %v328_v60 = vadd.f32 %v639_v32, %v327_v58 }
  0xe3   : > { %357 = vst [vmem:[%s959_s11 + $0x18] sm:$0xff] %v316_v59 }
  0xe4   : > { %361 = vst [vmem:[%s959_s11 + $0x38] sm:$0xff] %v328_v60  ;;  %v339_v61 = vpop.f32.mrf.mxu2  ;;  %v351_v62 = vpop.f32.mrf.mxu3 }
  0xe5   : > { %v340_v63 = vadd.f32 %v639_v32, %v339_v61  ;;  %v352_v0 = vadd.f32 %v639_v32, %v351_v62 }
  0xe7   : > { %365 = vst [vmem:[%s959_s11 + $0x58] sm:$0xff] %v340_v63 }
  0xe8   : > { %369 = vst [vmem:[%s959_s11 + $0x78] sm:$0xff] %v352_v0 }
  0xe9   : > { %727 = shalt.err (!%p724_p13)
}
  0xea   : > { %s790_s0 = smov 128   ;;  %s791_s29 = smov 8  }
  0xeb   : > { %572 = dma.vmem_to_hbm [thread:$0]  (%p863_p9), %s386_s4, 2048, %s388_s5, %s371_s15, %s790_s0, %s790_s0, %s791_s29  }
  0xec PF: > { %s402_s24 = sand.u32 1, %s766_s12   ;;  %p582_p0 = pnand %p501_p12, %p870_p11 }
  0xed   : > { %s403_s10 = scalar_lea.sflag [#allocation4], %s402_s24 }
  0xee   : > { %p583_p1 = pneg %p582_p0 }
  0xf0   : > { %761 = dma.done.wait (%p583_p1), %s403_s10, 2048  }
  0xf1   : > { %763 = vsyncadd (%p583_p1), %s403_s10, 4294965248  ;;  %s22_s17 = sadd.s32 1, %s786_s17   ;;  %s1027_s12 = smov %s770_s13 }
  0xf2   : > { %p19_p2 = scmp.ge.s32.totalorder %s22_s17, 4   ;;  %s1028_s13 = smov %s774_s14 }
  0xf3   : > { %s1029_s14 = smov %s868_s26  ;;  %s1030_s15 = smov %s782_s16 }
  0xf4   : > { %s1031_s16 = smov %s1033_s20  ;;  %21 = sbr.rel (!%p19_p2) target bundleno = 10 (0xa), region = 90 }
  0xf9   :  { %409 = vsyncpa [#allocation3], 1 }
  0xfa   :  { %411 = vsyncpa [#allocation3 + $0x1], 1 }
  0xfb   :  { %412 = vsyncpa [#allocation6], 1 }
  0xfc   :  { %414 = vsyncpa [#allocation6 + $0x1], 1 }
  0xfd   :  { %415 = vsyncpa [#allocation4], 1 }
  0xfe   :  { %417 = vsyncpa [#allocation4 + $0x1], 1 }

// kernel: tpu_custom_call.1
= control target key start
LH: loop header
LB: loop body
LE: loop exit
PB: predicated region body
PF: predicated region fallthrough
CT: control target
= control target key end

     0   :  { %s1016_s0 = inlined_call_operand.hbm [shape: f32[2,128,128], index: 0, kind: input, shape index: {}]   ;;  %s1017_s1 = inlined_call_operand.hbm [shape: f32[2,128,128], index: 1, kind: input, shape index: {}]   ;;  %s1018_s2 = inlined_call_operand.vmem [shape: f32[1,128], index: 2, kind: input, shape index: {}]   ;;  %s1019_s3 = inlined_call_operand.hbm [shape: f32[2,128,128], index: 3, kind: output, shape index: {}]  }
   0x1   :  { %1020 = sst [smem:[#allocation11_spill]] %s1016_s0 }
   0x2   :  { %8 = vsyncpa [#allocation3], 0 }
   0x3   :  { %10 = vsyncpa [#allocation3 + $0x1], 0 }
   0x4   :  { %11 = vsyncpa [#allocation6], 0 }
   0x5   :  { %13 = vsyncpa [#allocation6 + $0x1], 0 }
   0x6   :  { %14 = vsyncpa [#allocation4], 0 }
   0x7   :  { %16 = vsyncpa [#allocation4 + $0x1], 0  ;;  %s812_s12 = smov 0   ;;  %s814_s13 = smov 0  }
   0x8   :  { %s816_s14 = smov 0   ;;  %s818_s15 = smov 0  }
   0x9   :  { %s820_s16 = smov 0   ;;  %s822_s17 = smov 0  }
   0xa LB: > { %s498_s18 = sadd.s32 4294967295, %s786_s17   ;;  %s499_s19 = sadd.s32 4294967294, %s786_s17   ;;  %s786_s17 = sphi %s822_s17, %s22_s17   ;;  %s782_s16 = sphi %s820_s16, %s1031_s16   ;;  %s778_s15 = sphi %s818_s15, %s1030_s15   ;;  %s774_s14 = sphi %s816_s14, %s1029_s14   ;;  %s770_s13 = sphi %s814_s13, %s1028_s13   ;;  %s766_s12 = sphi %s812_s12, %s1027_s12  }
   0xb   : > { %s34_s20 = sadd.s32 1, %s782_s16  ;;  %s43_s21 = sadd.s32 1, %s774_s14 }
   0xc   : > { %p36_p0 = scmp.ge.s32.totalorder %s34_s20, 2  ;;  %p50_p1 = scmp.ne.s32.totalorder %s774_s14, %s770_s13 }
   0xd   : > { %p51_p2 = scmp.eq.s32.totalorder %s786_s17, 0  ;;  %p56_p3 = scmp.ne.s32.totalorder %s770_s13, %s766_s12 }
   0xe   : > { %s1033_s20 = smov (%p36_p0, %s34_s20), 0  ;;  %p57_p5 = scmp.eq.s32.totalorder %s498_s18, 0 }
   0xf   : > { %p853_p4 = por %p51_p2, %p50_p1  ;;  %s38_s23 = ssub.s32 %s782_s16, %s1033_s20 }
  0x10   : > { %p129_p6 = scmp.eq.s32.totalorder %s498_s18, 1  ;;  %p41_p7 = scmp.eq.s32.totalorder %s38_s23, 0 }
  0x11   : > { %p859_p8 = por %p57_p5, %p56_p3  ;;  %p135_p10 = scmp.eq.s32.totalorder %s499_s19, 1 }
  0x12   : > { %p863_p9 = por %p129_p6, %p50_p1  ;;  %p501_p12 = scmp.ge.s32.totalorder %s786_s17, 2 }
  0x13   : > { %s868_s26 = scalar_select %p41_p7, %s774_s14, %s43_s21  }
  0x14   : > { %p870_p11 = por %p135_p10, %p56_p3  ;;  %p585_p13 = scmp.lt.s32.totalorder %s786_s17, 2 }
  0x15   : > { %s877_s28 = sand.u32 1, %s774_s14   ;;  %s517_s30 = sshll.u32 %s782_s16, 7 }
  0x16   : > { %s502_s29 = sshll.u32 %s877_s28, 7  ;;  %s1025_s0 = sld [smem:[#allocation11_spill]] }
  0x17   : > { %s162_s7 = scalar_lea.vmem [#allocation2], %s502_s29  ;;  %p886_p0 = pnand %p585_p13, %p853_p4 }
  0x18   : > { %s172_s8 = sshll.u32 %s162_s7, 4  ;;  %p508_p1 = scmp.ge.s32.totalorder %s786_s17, 1  ;;  %s173_s8 = int_to_ptr.vmem [resolvable:$true] %s172_s8 }
  0x19   : > { %s159_s11 = scalar_lea.sflag [#allocation3], %s877_s28  ;;  %s788_s18 = smov 128  }
  0x1a   : > { %s789_s19 = smov 8   ;;  %p202_p2 = scmp.lt.s32.totalorder %s786_s17, 3 }
  0x1b   : > { %s191_s4 = scalar_lea.hbm %s1017_s1, %s517_s30  ;;  %s186_s22 = scalar_lea.vmem [#allocation5], %s502_s29 }
  0x1c   : > { %s169_s6 = scalar_lea.hbm %s1025_s0, %s517_s30  ;;  %p203_p3 = pnand %p508_p1, %p202_p2 }
  0x1d   : > { %s170_s9 = sshll.u32 %s169_s6, 4  ;;  %s192_s5 = sshll.u32 %s191_s4, 4  ;;  %s171_s9 = int_to_ptr.hbm [resolvable:$true] %s170_s9  ;;  %s193_s5 = int_to_ptr.hbm [resolvable:$true] %s192_s5 }
  0x1e   : > { %577 = dma.hbm_to_vmem [thread:$0]  (!%p886_p0), %s171_s9, 2048, %s173_s8, %s159_s11, %s788_s18, %s788_s18, %s789_s19  }
  0x1f   : > { %s194_s6 = sshll.u32 %s186_s22, 4  ;;  %s183_s7 = scalar_lea.sflag [#allocation6], %s877_s28  ;;  %s195_s6 = int_to_ptr.vmem [resolvable:$true] %s194_s6 }
  0x20   : > { %580 = dma.hbm_to_vmem [thread:$0]  (!%p886_p0), %s193_s5, 2048, %s195_s6, %s183_s7, %s788_s18, %s788_s18, %s789_s19  }
  0x21   : > { %206 = sbr.rel (%p203_p3) target bundleno = 236 (0xec), region = 32  ;;  %s902_s0 = sand.u32 (!%p203_p3), 1, %s770_s13  }
  0x22   : > { %s905_s8 = sshll.u32 (!%p203_p3), %s902_s0, 7  ;;  %s209_s30 = scalar_lea.sflag (!%p203_p3), [#allocation3], %s902_s0 }
  0x23   : > { %s909_s9 = scalar_lea.vmem (!%p203_p3), [#allocation2], %s905_s8 }
  0x26   : > { %753 = dma.done.wait (%p859_p8), %s209_s30, 2048  }
  0x27   : > { %755 = vsyncadd (%p859_p8), %s209_s30, 4294965248  ;;  %s219_s28 = scalar_lea.sflag [#allocation6], %s902_s0  ;;  %s917_s29 = scalar_lea.vmem [#allocation5], %s905_s8 }
  0x28   : > { %757 = dma.done.wait (%p859_p8), %s219_s28, 2048  }
  0x29   : > { %759 = vsyncadd (%p859_p8), %s219_s28, 4294965248  ;;  %v284_v0 = vld [vmem:[%s917_s29 + $0x78] sm:$0xff]  ;;  %v283_v1 = vld [vmem:[%s917_s29 + $0x70] sm:$0xff]  ;;  %s959_s11 = scalar_lea.vmem [#allocation7], %s905_s8  ;;  %s519_s18 = sshll.u32 %s778_s15, 7 }
  0x2a   : > { %521 = vmatpush.msra.mxu2 %v284_v0  ;;  %522 = vmatpush.msra.mxu3 %v284_v0  ;;  %v282_v2 = vld [vmem:[%s917_s29 + $0x68] sm:$0xff]  ;;  %v281_v3 = vld [vmem:[%s917_s29 + $0x60] sm:$0xff]  ;;  %v280_v4 = vld [vmem:[%s917_s29 + $0x58] sm:$0xff]  ;;  %s384_s23 = scalar_lea.hbm %s1019_s3, %s519_s18  ;;  %s385_s4 = sshll.u32 %s959_s11, 4  ;;  %s386_s4 = int_to_ptr.vmem [resolvable:$true] %s385_s4 }
  0x2b   : > { %289 = vmatpush.msra.mxu0 %v284_v0  ;;  %520 = vmatpush.msra.mxu1 %v284_v0  ;;  %v279_v5 = vld [vmem:[%s917_s29 + $0x50] sm:$0xff]  ;;  %v278_v6 = vld [vmem:[%s917_s29 + $0x48] sm:$0xff]  ;;  %v277_v7 = vld [vmem:[%s917_s29 + $0x40] sm:$0xff]  ;;  %s387_s5 = sshll.u32 %s384_s23, 4  ;;  %s371_s15 = scalar_lea.sflag [#allocation4], %s902_s0  ;;  %s388_s5 = int_to_ptr.hbm [resolvable:$true] %s387_s5 }
  0x2c   : > { %524 = vmatpush.msra.mxu2 %v283_v1  ;;  %525 = vmatpush.msra.mxu3 %v283_v1  ;;  %v276_v8 = vld [vmem:[%s917_s29 + $0x38] sm:$0xff]  ;;  %v275_v9 = vld [vmem:[%s917_s29 + $0x30] sm:$0xff]  ;;  %v274_v10 = vld [vmem:[%s917_s29 + $0x28] sm:$0xff]  ;;  %s714_s22 = sshra.s32 %s388_s5, 4  ;;  %s720_s30 = scalar_lea.hbm %s1019_s3, 256  ;;  %s715_s22 = int_to_ptr.hbm [resolvable:$true] %s714_s22 }
  0x2d   : > { %290 = vmatpush.msra.mxu0 %v283_v1  ;;  %523 = vmatpush.msra.mxu1 %v283_v1  ;;  %v273_v11 = vld [vmem:[%s917_s29 + $0x20] sm:$0xff]  ;;  %v272_v12 = vld [vmem:[%s917_s29 + $0x18] sm:$0xff]  ;;  %v271_v13 = vld [vmem:[%s917_s29 + $0x10] sm:$0xff]  ;;  %s716_s6 = scalar_lea.hbm %s715_s22, 128  ;;  %p721_p7 = scmp.lt.s32.totalorder %s715_s22, %s1019_s3 }
  0x2e   : > { %527 = vmatpush.msra.mxu2 %v282_v2  ;;  %528 = vmatpush.msra.mxu3 %v282_v2  ;;  %v270_v14 = vld [vmem:[%s917_s29 + $0x8] sm:$0xff]  ;;  %v269_v15 = vld [vmem:[%s917_s29] sm:$0xff]  ;;  %v263_v24 = vld [vmem:[%s909_s9 + $0x50] sm:$0xff]  ;;  %p717_p4 = scmp.ne.s32.totalorder %s715_s22, %s716_s6  ;;  %p722_p8 = scmp.lt.s32.totalorder %s720_s30, %s716_s6 }
  0x2f   : > { %291 = vmatpush.msra.mxu0 %v282_v2  ;;  %526 = vmatpush.msra.mxu1 %v282_v2  ;;  %v261_v16 = vld [vmem:[%s909_s9 + $0x40] sm:$0xff]  ;;  %v262_v20 = vld [vmem:[%s909_s9 + $0x48] sm:$0xff]  ;;  %v267_v25 = vld [vmem:[%s909_s9 + $0x70] sm:$0xff] }
  0x30   : > { %530 = vmatpush.msra.mxu2 %v281_v3  ;;  %531 = vmatpush.msra.mxu3 %v281_v3  ;;  %v265_v17 = vld [vmem:[%s909_s9 + $0x60] sm:$0xff]  ;;  %v266_v21 = vld [vmem:[%s909_s9 + $0x68] sm:$0xff]  ;;  %v255_v26 = vld [vmem:[%s909_s9 + $0x10] sm:$0xff]  ;;  %p718_p5 = pnand %p717_p4, %p863_p9  ;;  %p723_p10 = por %p722_p8, %p721_p7 }
  0x31   : > { %292 = vmatpush.msra.mxu0 %v281_v3  ;;  %529 = vmatpush.msra.mxu1 %v281_v3  ;;  %v253_v18 = vld [vmem:[%s909_s9] sm:$0xff]  ;;  %v254_v22 = vld [vmem:[%s909_s9 + $0x8] sm:$0xff]  ;;  %v259_v27 = vld [vmem:[%s909_s9 + $0x30] sm:$0xff] }
  0x32   : > { %533 = vmatpush.msra.mxu2 %v280_v4  ;;  %534 = vmatpush.msra.mxu3 %v280_v4  ;;  %v257_v19 = vld [vmem:[%s909_s9 + $0x20] sm:$0xff]  ;;  %v258_v23 = vld [vmem:[%s909_s9 + $0x28] sm:$0xff]  ;;  %v264_v28 = vld [vmem:[%s909_s9 + $0x58] sm:$0xff]  ;;  %p719_p6 = pneg %p718_p5 }
  0x33   : > { %293 = vmatpush.msra.mxu0 %v280_v4  ;;  %532 = vmatpush.msra.mxu1 %v280_v4  ;;  %v268_v29 = vld [vmem:[%s909_s9 + $0x78] sm:$0xff]  ;;  %v639_v32 = vld [vmem:[%s1018_s2] ss:$0 sm:$0xff] }
  0x34   : > { %536 = vmatpush.msra.mxu2 %v279_v5  ;;  %537 = vmatpush.msra.mxu3 %v279_v5  ;;  %v256_v30 = vld [vmem:[%s909_s9 + $0x18] sm:$0xff]  ;;  %p724_p13 = pnand %p723_p10, %p719_p6 }
  0x35   : > { %294 = vmatpush.msra.mxu0 %v279_v5  ;;  %535 = vmatpush.msra.mxu1 %v279_v5  ;;  %v260_v31 = vld [vmem:[%s909_s9 + $0x38] sm:$0xff] }
  0x36   : > { %539 = vmatpush.msra.mxu2 %v278_v6  ;;  %540 = vmatpush.msra.mxu3 %v278_v6 }
  0x37   : > { %295 = vmatpush.msra.mxu0 %v278_v6  ;;  %538 = vmatpush.msra.mxu1 %v278_v6 }
  0x38   : > { %542 = vmatpush.msra.mxu2 %v277_v7  ;;  %543 = vmatpush.msra.mxu3 %v277_v7 }
  0x39   : > { %296 = vmatpush.msra.mxu0 %v277_v7  ;;  %541 = vmatpush.msra.mxu1 %v277_v7 }
  0x3a   : > { %545 = vmatpush.msra.mxu2 %v276_v8  ;;  %546 = vmatpush.msra.mxu3 %v276_v8 }
  0x3b   : > { %297 = vmatpush.msra.mxu0 %v276_v8  ;;  %544 = vmatpush.msra.mxu1 %v276_v8 }
  0x3c   : > { %548 = vmatpush.msra.mxu2 %v275_v9  ;;  %549 = vmatpush.msra.mxu3 %v275_v9 }
  0x3d   : > { %298 = vmatpush.msra.mxu0 %v275_v9  ;;  %547 = vmatpush.msra.mxu1 %v275_v9 }
  0x3e   : > { %551 = vmatpush.msra.mxu2 %v274_v10  ;;  %552 = vmatpush.msra.mxu3 %v274_v10 }
  0x3f   : > { %299 = vmatpush.msra.mxu0 %v274_v10  ;;  %550 = vmatpush.msra.mxu1 %v274_v10 }
  0x40   : > { %554 = vmatpush.msra.mxu2 %v273_v11  ;;  %555 = vmatpush.msra.mxu3 %v273_v11 }
  0x41   : > { %300 = vmatpush.msra.mxu0 %v273_v11  ;;  %553 = vmatpush.msra.mxu1 %v273_v11 }
  0x42   : > { %557 = vmatpush.msra.mxu2 %v272_v12  ;;  %558 = vmatpush.msra.mxu3 %v272_v12 }
  0x43   : > { %301 = vmatpush.msra.mxu0 %v272_v12  ;;  %556 = vmatpush.msra.mxu1 %v272_v12 }
  0x44   : > { %560 = vmatpush.msra.mxu2 %v271_v13  ;;  %561 = vmatpush.msra.mxu3 %v271_v13 }
  0x45   : > { %302 = vmatpush.msra.mxu0 %v271_v13  ;;  %559 = vmatpush.msra.mxu1 %v271_v13 }
  0x46   : > { %563 = vmatpush.msra.mxu2 %v270_v14  ;;  %564 = vmatpush.msra.mxu3 %v270_v14 }
  0x47   : > { %303 = vmatpush.msra.mxu0 %v270_v14  ;;  %562 = vmatpush.msra.mxu1 %v270_v14 }
  0x48   : > { %566 = vmatpush.msra.mxu2 %v269_v15  ;;  %567 = vmatpush.msra.mxu3 %v269_v15 }
  0x49   : > { %329 = vmatmul.f32.vlgmr.msra.gmra.mxu2 %v261_v16  ;;  %341 = vmatmul.f32.vlgmr.msra.gmra.mxu3 %v265_v17 }
  0x4a   : > { %304 = vmatpush.msra.mxu0 %v269_v15  ;;  %565 = vmatpush.msra.mxu1 %v269_v15 }
  0x4b   : > { %305 = vmatmul.f32.vlgmr.msra.gmra.mxu0 %v253_v18  ;;  %317 = vmatmul.f32.vlgmr.msra.gmra.mxu1 %v257_v19 }
  0x51   : > { %332 = vmatmul.f32.gmra.mxu2 %v262_v20  ;;  %344 = vmatmul.f32.gmra.mxu3 %v266_v21 }
  0x53   : > { %308 = vmatmul.f32.gmra.mxu0 %v254_v22  ;;  %320 = vmatmul.f32.gmra.mxu1 %v258_v23 }
  0x59   : > { %335 = vmatmul.f32.gmra.mxu2 %v263_v24  ;;  %347 = vmatmul.f32.gmra.mxu3 %v267_v25 }
  0x5b   : > { %311 = vmatmul.f32.gmra.mxu0 %v255_v26  ;;  %323 = vmatmul.f32.gmra.mxu1 %v259_v27 }
  0x61   : > { %338 = vmatmul.f32.gmra.mxu2 %v264_v28  ;;  %350 = vmatmul.f32.gmra.mxu3 %v268_v29 }
  0x63   : > { %314 = vmatmul.f32.gmra.mxu0 %v256_v30  ;;  %326 = vmatmul.f32.gmra.mxu1 %v260_v31 }
  0xc8   : > { %v306_v33 = vpop.f32.mrf.mxu0  ;;  %v318_v34 = vpop.f32.mrf.mxu1 }
  0xc9   : > { %v307_v35 = vadd.f32 %v639_v32, %v306_v33  ;;  %v319_v36 = vadd.f32 %v639_v32, %v318_v34 }
  0xcb   : > { %354 = vst [vmem:[%s959_s11] sm:$0xff] %v307_v35 }
  0xcc   : > { %358 = vst [vmem:[%s959_s11 + $0x20] sm:$0xff] %v319_v36  ;;  %v330_v37 = vpop.f32.mrf.mxu2  ;;  %v342_v38 = vpop.f32.mrf.mxu3 }
  0xcd   : > { %v331_v39 = vadd.f32 %v639_v32, %v330_v37  ;;  %v343_v40 = vadd.f32 %v639_v32, %v342_v38 }
  0xcf   : > { %362 = vst [vmem:[%s959_s11 + $0x40] sm:$0xff] %v331_v39 }
  0xd0   : > { %366 = vst [vmem:[%s959_s11 + $0x60] sm:$0xff] %v343_v40  ;;  %v309_v41 = vpop.f32.mrf.mxu0  ;;  %v321_v42 = vpop.f32.mrf.mxu1 }
  0xd1   : > { %v310_v43 = vadd.f32 %v639_v32, %v309_v41  ;;  %v322_v44 = vadd.f32 %v639_v32, %v321_v42 }
  0xd3   : > { %355 = vst [vmem:[%s959_s11 + $0x8] sm:$0xff] %v310_v43 }
  0xd4   : > { %359 = vst [vmem:[%s959_s11 + $0x28] sm:$0xff] %v322_v44  ;;  %v333_v45 = vpop.f32.mrf.mxu2  ;;  %v345_v46 = vpop.f32.mrf.mxu3 }
  0xd5   : > { %v334_v47 = vadd.f32 %v639_v32, %v333_v45  ;;  %v346_v48 = vadd.f32 %v639_v32, %v345_v46 }
  0xd7   : > { %363 = vst [vmem:[%s959_s11 + $0x48] sm:$0xff] %v334_v47 }
  0xd8   : > { %367 = vst [vmem:[%s959_s11 + $0x68] sm:$0xff] %v346_v48  ;;  %v312_v49 = vpop.f32.mrf.mxu0  ;;  %v324_v50 = vpop.f32.mrf.mxu1 }
  0xd9   : > { %v313_v51 = vadd.f32 %v639_v32, %v312_v49  ;;  %v325_v52 = vadd.f32 %v639_v32, %v324_v50 }
  0xdb   : > { %356 = vst [vmem:[%s959_s11 + $0x10] sm:$0xff] %v313_v51 }
  0xdc   : > { %360 = vst [vmem:[%s959_s11 + $0x30] sm:$0xff] %v325_v52  ;;  %v336_v53 = vpop.f32.mrf.mxu2  ;;  %v348_v54 = vpop.f32.mrf.mxu3 }
  0xdd   : > { %v337_v55 = vadd.f32 %v639_v32, %v336_v53  ;;  %v349_v56 = vadd.f32 %v639_v32, %v348_v54 }
  0xdf   : > { %364 = vst [vmem:[%s959_s11 + $0x50] sm:$0xff] %v337_v55 }
  0xe0   : > { %368 = vst [vmem:[%s959_s11 + $0x70] sm:$0xff] %v349_v56  ;;  %v315_v57 = vpop.f32.mrf.mxu0  ;;  %v327_v58 = vpop.f32.mrf.mxu1 }
  0xe1   : > { %v316_v59 = vadd.f32 %v639_v32, %v315_v57  ;;  %v328_v60 = vadd.f32 %v639_v32, %v327_v58 }
  0xe3   : > { %357 = vst [vmem:[%s959_s11 + $0x18] sm:$0xff] %v316_v59 }
  0xe4   : > { %361 = vst [vmem:[%s959_s11 + $0x38] sm:$0xff] %v328_v60  ;;  %v339_v61 = vpop.f32.mrf.mxu2  ;;  %v351_v62 = vpop.f32.mrf.mxu3 }
  0xe5   : > { %v340_v63 = vadd.f32 %v639_v32, %v339_v61  ;;  %v352_v0 = vadd.f32 %v639_v32, %v351_v62 }
  0xe7   : > { %365 = vst [vmem:[%s959_s11 + $0x58] sm:$0xff] %v340_v63 }
  0xe8   : > { %369 = vst [vmem:[%s959_s11 + $0x78] sm:$0xff] %v352_v0 }
  0xe9   : > { %727 = shalt.err (!%p724_p13)
}
  0xea   : > { %s790_s0 = smov 128   ;;  %s791_s29 = smov 8  }
  0xeb   : > { %572 = dma.vmem_to_hbm [thread:$0]  (%p863_p9), %s386_s4, 2048, %s388_s5, %s371_s15, %s790_s0, %s790_s0, %s791_s29  }
  0xec PF: > { %s402_s24 = sand.u32 1, %s766_s12   ;;  %p582_p0 = pnand %p501_p12, %p870_p11 }
  0xed   : > { %s403_s10 = scalar_lea.sflag [#allocation4], %s402_s24 }
  0xee   : > { %p583_p1 = pneg %p582_p0 }
  0xf0   : > { %761 = dma.done.wait (%p583_p1), %s403_s10, 2048  }
  0xf1   : > { %763 = vsyncadd (%p583_p1), %s403_s10, 4294965248  ;;  %s22_s17 = sadd.s32 1, %s786_s17   ;;  %s1027_s12 = smov %s770_s13 }
  0xf2   : > { %p19_p2 = scmp.ge.s32.totalorder %s22_s17, 4   ;;  %s1028_s13 = smov %s774_s14 }
  0xf3   : > { %s1029_s14 = smov %s868_s26  ;;  %s1030_s15 = smov %s782_s16 }
  0xf4   : > { %s1031_s16 = smov %s1033_s20  ;;  %21 = sbr.rel (!%p19_p2) target bundleno = 10 (0xa), region = 90 }
  0xf9   :  { %409 = vsyncpa [#allocation3], 1 }
  0xfa   :  { %411 = vsyncpa [#allocation3 + $0x1], 1 }
  0xfb   :  { %412 = vsyncpa [#allocation6], 1 }
  0xfc   :  { %414 = vsyncpa [#allocation6 + $0x1], 1 }
  0xfd   :  { %415 = vsyncpa [#allocation4], 1 }
  0xfe   :  { %417 = vsyncpa [#allocation4 + $0x1], 1 }

</bundles_post_ra>
